<compile_context>
chip_gen: v7x
topology: tpu7x:2x2x1
jax: 0.10.0
libtpu: 0.0.40
codegen_flags: <defaults>
</compile_context>

<pallas_src>
import jax
import jax.numpy as jnp
from jax.experimental import pallas as pl
from jax.experimental.pallas import tpu as pltpu

_LANES = 128
_SUBLANES = 8


def _rmse_partial_kernel(p_ref, m_ref, out_ref):
    """Per-block masked sum-of-squares and mask-count partials.

    p_ref:   (tr, 128) VMEM tile of the first output channel (lane-dense).
    m_ref:   (tr, 128) VMEM tile of the second target channel (marks).
    out_ref: (1, 2, 8, 128) VMEM per-block partials:
             out_ref[0, 0] = per-lane partial sum(p0^2 * mask)
             out_ref[0, 1] = per-lane partial count(mask)
    """
    tr = p_ref.shape[0]
    p = p_ref[...].astype(jnp.float32)
    mask = (m_ref[...] == 2).astype(jnp.float32)
    sq = p * p * mask
    # Group rows in native (8, 128) sublane tiles and add them elementwise
    # (pure VPU); the cheap cross-lane reduce of the tiny (8,128) partials is
    # deferred to plain JAX outside the kernel.
    out_ref[0, 0] = jnp.sum(sq.reshape(tr // _SUBLANES, _SUBLANES, _LANES), axis=0)
    out_ref[0, 1] = jnp.sum(mask.reshape(tr // _SUBLANES, _SUBLANES, _LANES), axis=0)


def _round_up(x, m):
    return (x + m - 1) // m * m


def rmse_loss(output, target, *, block_rows=None, target_tile_bytes=1 << 20):
    """Pallas implementation of RmseLoss_0.forward(output, target).

    output: (T, B, C_out); target: (T, B, C_tgt) with marks in channel 1.
    """
    T, B, C_out = output.shape
    Tt, Bt, C_tgt = target.shape
    assert T == Tt and B == Bt and C_out >= 1 and C_tgt >= 2

    # 1) Pre-slice the only channels the loss reads (keep native dtype; the
    #    f32 cast happens in-kernel under the DMA shadow) and flatten.
    p0 = output[:, :, 0].reshape(-1)
    marks = target[:, :, 1].reshape(-1)
    n = p0.shape[0]

    # 2) Lane-dense layout: pad to a whole number of (block_rows, 128) tiles.
    rows = pl.cdiv(n, _LANES)
    itemsize = max(jnp.dtype(p0.dtype).itemsize, jnp.dtype(marks.dtype).itemsize)
    if block_rows is None:
        block_rows = max(_SUBLANES, target_tile_bytes // (_LANES * itemsize))
    block_rows = _round_up(min(block_rows, _round_up(rows, _SUBLANES)), _SUBLANES)
    num_blocks = pl.cdiv(rows, block_rows)
    padded_rows = num_blocks * block_rows

    pad = padded_rows * _LANES - n
    # Pad p0 with 0 (0^2 adds nothing) and marks with 0 (!= 2, never counted).
    p2d = jnp.pad(p0, (0, pad)).reshape(padded_rows, _LANES)
    m2d = jnp.pad(marks, (0, pad)).reshape(padded_rows, _LANES)

    partials = pl.pallas_call(
        _rmse_partial_kernel,
        out_shape=jax.ShapeDtypeStruct(
            (num_blocks, 2, _SUBLANES, _LANES), jnp.float32),
        grid=(num_blocks,),
        in_specs=[
            pl.BlockSpec((block_rows, _LANES), lambda i: (i, 0)),
            pl.BlockSpec((block_rows, _LANES), lambda i: (i, 0)),
        ],
        out_specs=pl.BlockSpec((1, 2, _SUBLANES, _LANES),
                               lambda i: (i, 0, 0, 0)),
        compiler_params=pltpu.CompilerParams(
            dimension_semantics=("parallel",),      # independent blocks -> 2 TCs on v7x
            vmem_limit_bytes=32 * 1024 * 1024,      # headroom, still within v7x VMEM
        ),
    )(p2d, m2d)

    sum_sq = jnp.sum(partials[:, 0])
    count = jnp.sum(partials[:, 1])
    # Empty-mask case -> loss = 0 (matches `if indices[0].size == 0`).
    return jnp.where(count > 0.0,
                     jnp.sqrt(sum_sq / jnp.maximum(count, 1.0)),
                     jnp.float32(0.0))


def _reference(output, target):
    p0 = output[:, :, 0].astype(jnp.float32)
    marks = target[:, :, 1].astype(jnp.float32)
    mask = (marks == 2.0).astype(jnp.float32)
    count = jnp.sum(mask)
    sum_sq = jnp.sum(p0 * p0 * mask)
    return jnp.where(count > 0.0,
                     jnp.sqrt(sum_sq / jnp.maximum(count, 1.0)),
                     jnp.float32(0.0))


if __name__ == "__main__":
    key = jax.random.PRNGKey(0)
    k1, k2, k3 = jax.random.split(key, 3)

    T, B = 16, 6          # time steps, basins/batch (small, not 128-aligned)
    C_out, C_tgt = 3, 2   # output channels, target channels

    output = jax.random.normal(k1, (T, B, C_out), dtype=jnp.float32)

    # target channel 0: arbitrary values; channel 1: marks in {0, 1, 2}
    tgt_vals = jax.random.normal(k2, (T, B), dtype=jnp.float32)
    marks = jax.random.randint(k3, (T, B), 0, 3).astype(jnp.float32)
    target = jnp.stack([tgt_vals, marks], axis=-1)  # (T, B, 2)

    loss = jax.block_until_ready(rmse_loss(output, target))
    ref = _reference(output, target)
    assert jnp.allclose(loss, ref, rtol=1e-5, atol=1e-6), (loss, ref)

    # Empty-mask case: no marks == 2 -> loss must be exactly 0.
    target_empty = jnp.stack([tgt_vals, jnp.zeros_like(marks)], axis=-1)
    loss_empty = jax.block_until_ready(rmse_loss(output, target_empty))
    assert jnp.allclose(loss_empty, 0.0), loss_empty

    print("KERNEL_OK")
</pallas_src>

<mosaic_0001>
module attributes {stable_mosaic.version = 11 : i64} {
  func.func @_rmse_partial_kernel(%arg0: i32, %arg1: memref<8x128xf32, #tpu.memory_space<vmem>>, %arg2: memref<8x128xf32, #tpu.memory_space<vmem>>, %arg3: memref<1x2x8x128xf32, #tpu.memory_space<vmem>>) attributes {dimension_semantics = [#tpu.dimension_semantics<parallel>], iteration_bounds = array<i64: 1>, scalar_prefetch = 0 : i64, scratch_operands = 0 : i64, tpu.core_type = #tpu.core_type<tc>, window_params = [{transform_indices = @transform_0, window_bounds = array<i64: 8, 128>}, {transform_indices = @transform_1, window_bounds = array<i64: 8, 128>}, {transform_indices = @transform_2, window_bounds = array<i64: 1, 2, 8, 128>}]} {
    %c0 = arith.constant 0 : index
    %c0_0 = arith.constant 0 : index
    %0 = vector.load %arg1[%c0, %c0_0] : memref<8x128xf32, #tpu.memory_space<vmem>>, vector<8x128xf32>
    %c0_1 = arith.constant 0 : index
    %c0_2 = arith.constant 0 : index
    %1 = vector.load %arg2[%c0_1, %c0_2] : memref<8x128xf32, #tpu.memory_space<vmem>>, vector<8x128xf32>
    %cst = arith.constant 2.000000e+00 : f32
    %2 = vector.broadcast %cst : f32 to vector<8x128xf32>
    %3 = arith.cmpf oeq, %1, %2 : vector<8x128xf32>
    %4 = arith.extui %3 : vector<8x128xi1> to vector<8x128xi32>
    %5 = arith.sitofp %4 : vector<8x128xi32> to vector<8x128xf32>
    %6 = arith.mulf %0, %0 : vector<8x128xf32>
    %7 = arith.mulf %6, %5 : vector<8x128xf32>
    %8 = vector.shape_cast %7 : vector<8x128xf32> to vector<1x8x128xf32>
    %cst_3 = arith.constant dense<0.000000e+00> : vector<8x128xf32>
    %9 = vector.multi_reduction <add>, %8, %cst_3 [0] : vector<1x8x128xf32> to vector<8x128xf32>
    %c0_4 = arith.constant 0 : index
    %c0_5 = arith.constant 0 : index
    %c0_6 = arith.constant 0 : index
    %c0_7 = arith.constant 0 : index
    %10 = vector.load %arg3[%c0_4, %c0_5, %c0_6, %c0_7] : memref<1x2x8x128xf32, #tpu.memory_space<vmem>>, vector<1x1x8x128xf32>
    %11 = vector.shape_cast %10 : vector<1x1x8x128xf32> to vector<8x128xf32>
    %12 = vector.shape_cast %9 : vector<8x128xf32> to vector<1x1x8x128xf32>
    tpu.vector_store %arg3[%c0_4, %c0_5, %c0_6, %c0_7], %12 {strides = array<i32>} : memref<1x2x8x128xf32, #tpu.memory_space<vmem>>, vector<1x1x8x128xf32>,
    %13 = vector.shape_cast %5 : vector<8x128xf32> to vector<1x8x128xf32>
    %cst_8 = arith.constant dense<0.000000e+00> : vector<8x128xf32>
    %14 = vector.multi_reduction <add>, %13, %cst_8 [0] : vector<1x8x128xf32> to vector<8x128xf32>
    %c0_9 = arith.constant 0 : index
    %c1 = arith.constant 1 : index
    %c0_10 = arith.constant 0 : index
    %c0_11 = arith.constant 0 : index
    %15 = vector.load %arg3[%c0_9, %c1, %c0_10, %c0_11] : memref<1x2x8x128xf32, #tpu.memory_space<vmem>>, vector<1x1x8x128xf32>
    %16 = vector.shape_cast %15 : vector<1x1x8x128xf32> to vector<8x128xf32>
    %17 = vector.shape_cast %14 : vector<8x128xf32> to vector<1x1x8x128xf32>
    tpu.vector_store %arg3[%c0_9, %c1, %c0_10, %c0_11], %17 {strides = array<i32>} : memref<1x2x8x128xf32, #tpu.memory_space<vmem>>, vector<1x1x8x128xf32>,
    return
  }
  func.func @transform_0(%arg0: i32) -> (i32, i32) {
    %c0_i32 = arith.constant 0 : i32
    %c0_i32_0 = arith.constant 0 : i32
    return %arg0, %c0_i32 : i32, i32
  }
  func.func @transform_1(%arg0: i32) -> (i32, i32) {
    %c0_i32 = arith.constant 0 : i32
    %c0_i32_0 = arith.constant 0 : i32
    return %arg0, %c0_i32 : i32, i32
  }
  func.func @transform_2(%arg0: i32) -> (i32, i32, i32, i32) {
    %c0_i32 = arith.constant 0 : i32
    %c0_i32_0 = arith.constant 0 : i32
    %c0_i32_1 = arith.constant 0 : i32
    %c0_i32_2 = arith.constant 0 : i32
    return %arg0, %c0_i32, %c0_i32_0, %c0_i32_1 : i32, i32, i32, i32
  }
}

</mosaic_0001>

<bundles_post_ra>
// kernel: tpu_custom_call.1
= control target key start
LH: loop header
LB: loop body
LE: loop exit
PB: predicated region body
PF: predicated region fallthrough
CT: control target
= control target key end

     0   :  { %7 = vsyncpa [#allocation3], 0  ;;  %s202_s0 = inlined_call_operand.hbm [shape: f32[8,128], index: 0, kind: input, shape index: {}]   ;;  %s203_s1 = inlined_call_operand.hbm [shape: f32[8,128], index: 1, kind: input, shape index: {}]   ;;  %s204_s2 = inlined_call_operand.hbm [shape: f32[1,2,8,128], index: 2, kind: output, shape index: {}]  }
   0x1   :  { %8 = vsyncpa [#allocation6], 0 }
   0x2   :  { %9 = vsyncpa [#allocation4], 0  ;;  %s145_s9 = smov [#allocation2]   ;;  %s146_s11 = smov [#allocation5]  }
   0x3   :  { %s16_s10 = sshll.u32 %s145_s9, 4  ;;  %s26_s12 = sshll.u32 %s146_s11, 4  ;;  %s17_s10 = int_to_ptr.vmem [resolvable:$true] %s16_s10  ;;  %s27_s12 = int_to_ptr.vmem [resolvable:$true] %s26_s12 }
   0x4   :  { %s73_s15 = scalar_lea.hbm %s202_s0, 128 }
   0x5   :  { %p74_p0 = scmp.ne.s32.totalorder %s202_s0, %s73_s15  ;;  %p77_p1 = scmp.lt.u32.totalorder %s73_s15, %s202_s0 }
   0x7   :  { %p79_p2 = pnand %p77_p1, %p74_p0 }
   0x9   :  { %82 = shalt.err (!%p79_p2)
}
   0xa   :  { %s83_s20 = scalar_lea.vmem %s17_s10, 128  ;;  %p88_p4 = scmp.lt.s32.totalorder %s17_s10, %s17_s10 }
   0xb   :  { %p84_p3 = scmp.ne.s32.totalorder %s17_s10, %s83_s20  ;;  %p89_p5 = scmp.lt.s32.totalorder %s83_s20, %s83_s20 }
   0xd   :  { %p90_p6 = por %p89_p5, %p88_p4 }
   0xf   :  { %p91_p7 = pnand %p90_p6, %p84_p3 }
  0x11   :  { %94 = shalt.err (!%p91_p7)
}
  0x12   :  { %19 = dma.hbm_to_vmem [thread:$0]  %s202_s0, 128, %s17_s10, [#allocation3]  }
  0x13   :  { %s95_s25 = scalar_lea.hbm %s203_s1, 128 }
  0x14   :  { %p96_p8 = scmp.ne.s32.totalorder %s203_s1, %s95_s25  ;;  %p99_p9 = scmp.lt.u32.totalorder %s95_s25, %s203_s1 }
  0x16   :  { %p101_p10 = pnand %p99_p9, %p96_p8 }
  0x18   :  { %104 = shalt.err (!%p101_p10)
}
  0x19   :  { %s105_s30 = scalar_lea.vmem %s27_s12, 128  ;;  %p110_p12 = scmp.lt.s32.totalorder %s27_s12, %s27_s12 }
  0x1a   :  { %p106_p11 = scmp.ne.s32.totalorder %s27_s12, %s105_s30  ;;  %p111_p13 = scmp.lt.s32.totalorder %s105_s30, %s105_s30 }
  0x1c   :  { %p112_p0 = por %p111_p13, %p110_p12 }
  0x1e   :  { %p113_p1 = pnand %p112_p0, %p106_p11 }
  0x20   :  { %116 = shalt.err (!%p113_p1)
}
  0x21   :  { %29 = dma.hbm_to_vmem [thread:$0]  %s203_s1, 128, %s27_s12, [#allocation6]  }
  0x22   :  { %139 = dma.done.wait [#allocation3], 128  }
  0x23   :  { %140 = vsyncadd [#allocation3], 4294967168 }
  0x24   :  { %141 = dma.done.wait [#allocation6], 128  }
  0x25   :  { %142 = vsyncadd [#allocation6], 4294967168  ;;  %v36_v0 = vld [vmem:[#allocation2] sm:$0xff]  ;;  %v37_v1 = vld [vmem:[#allocation5] sm:$0xff]  ;;  %s147_s4 = smov [#allocation7]   ;;  %v148_v3 = vmov 0.0  }
  0x26   :  { %s53_s5 = sshll.u32 %s147_s4, 4  ;;  %vm38_vm0 = vcmp.eq.f32.partialorder %v37_v1, 2.0  ;;  %v41_v2 = vmul.f32 %v36_v0, %v36_v0  ;;  %s54_s5 = int_to_ptr.vmem [resolvable:$true] %s53_s5 }
  0x27   :  { %v66_v4 = vsel %vm38_vm0, 1.0, %v148_v3  ;;  %s117_s6 = scalar_lea.vmem %s54_s5, 256  ;;  %p122_p3 = scmp.lt.s32.totalorder %s54_s5, %s54_s5 }
  0x28   :  { %v42_v5 = vmul.f32 %v66_v4, %v41_v2  ;;  %47 = vst [vmem:[#allocation7 + $0x8] sm:$0xff] %v66_v4  ;;  %p118_p2 = scmp.ne.s32.totalorder %s54_s5, %s117_s6  ;;  %p123_p4 = scmp.lt.s32.totalorder %s117_s6, %s117_s6 }
  0x2a   :  { %44 = vst [vmem:[#allocation7] sm:$0xff] %v42_v5  ;;  %p124_p5 = por %p123_p4, %p122_p3 }
  0x2c   :  { %p125_p6 = pnand %p124_p5, %p118_p2 }
  0x2e   :  { %128 = shalt.err (!%p125_p6)
}
  0x2f   :  { %s129_s8 = scalar_lea.hbm %s204_s2, 256 }
  0x30   :  { %p130_p7 = scmp.ne.s32.totalorder %s204_s2, %s129_s8  ;;  %p133_p8 = scmp.lt.u32.totalorder %s129_s8, %s204_s2 }
  0x32   :  { %p135_p9 = pnand %p133_p8, %p130_p7 }
  0x34   :  { %138 = shalt.err (!%p135_p9)
}
  0x35   :  { %s149_s13 = smov 128   ;;  %s150_s14 = smov 8  }
  0x36   :  { %59 = dma.vmem_to_hbm [thread:$0]  %s54_s5, 256, %s204_s2, [#allocation4], %s149_s13, %s149_s13, %s150_s14  }
  0x37   :  { %143 = dma.done.wait [#allocation4], 256  }
  0x38   :  { %144 = vsyncadd [#allocation4], 4294967040 }
  0x39   :  { %63 = vsyncpa [#allocation3], 1 }
  0x3a   :  { %64 = vsyncpa [#allocation6], 1 }
  0x3b   :  { %65 = vsyncpa [#allocation4], 1 }

</bundles_post_ra>
